<compile_context>
chip_gen: v6e
topology: v6e:2x2x1
jax: 0.10.0
libtpu: 0.0.40
codegen_flags: <defaults>
</compile_context>

<pallas_src>
import functools

import jax
import jax.numpy as jnp
from jax.experimental import pallas as pl
from jax.experimental.pallas import tpu as pltpu


def _graph_distill_kernel(adj_ref, s_ref, v_ref, b_ref, out_ref,
                          *, denom_col, use_bf16_exp):
    adj = adj_ref[...]                                        # [TM, N] f32
    tm, n = adj.shape

    # Self-loop mask as a single fused select (no eye materialized).
    row0 = pl.program_id(0) * tm
    local_row = jax.lax.broadcasted_iota(jnp.int32, (tm, n), 0)
    col = jax.lax.broadcasted_iota(jnp.int32, (tm, n), 1)
    logits = jnp.where(local_row + row0 == col, -1e30, adj * 5.0)

    # Numerically-stable softmax numerator. Edge weights are not assumed
    # bounded, so keep the row-max subtraction.
    m = jnp.max(logits, axis=-1, keepdims=True)
    x = logits - m
    if use_bf16_exp:
        e = jnp.exp(x.astype(jnp.bfloat16))                   # bf16 EUP (v6e/v7x)
    else:
        e = jnp.exp(x).astype(jnp.bfloat16)                   # f32 EUP (v5e & older)

    # Single lane-dense MXU matmul: [TM,N] x [N,H_pad] -> [TM,H_pad] f32.
    # Column `denom_col` of V is all-ones, so the softmax denominator falls
    # out of the same matmul (f32 accumulation) — no XLU reduction needed.
    nv = jnp.dot(e, v_ref[...], preferred_element_type=jnp.float32)
    denom = nv[:, denom_col:denom_col + 1]                    # [TM, 1]
    neigh = nv * (1.0 / denom)                                # exact reciprocal

    # out = tanh( self_proj + (b_o - b_d) - neigh );  dropout = identity (eval).
    out = jnp.tanh(s_ref[...] + b_ref[...] - neigh)
    out_ref[...] = out.astype(out_ref.dtype)


def _bf16_eup_available():
    """bf16 VPU/EUP exists on v6e/v7x; v5e and older upconvert (no benefit)."""
    try:
        kind = jax.devices()[0].device_kind.lower()
    except Exception:
        return False
    return not any(tok in kind for tok in ("v2", "v3", "v4", "v5"))


def _vmem_capacity_bytes():
    try:
        return int(pltpu.get_tpu_info().vmem_capacity_bytes)
    except Exception:
        return 64 << 20            # conservative fallback (v7x per-TC VMEM)


def graph_distill_forward(features, key_features, adj_matrix, params,
                          *, block_rows=128, min_grid_steps=8):
    """Returns (feature_updated, feature_updated), matching the PyTorch module
    with withAgg=False, activation=True, dropout in eval mode."""
    del key_features                        # unused when withAgg=False
    n, d = features.shape
    w_d, b_d, w_o, b_o = params             # [H,2D], [H], [H,D], [H]
    h = w_o.shape[0]

    # ---- fold projections into the features (tiny [N,D]x[D,H] XLA matmuls) ----
    feat32 = features.astype(jnp.float32)
    w_fold = (w_o.astype(jnp.float32) - w_d[:, :d].astype(jnp.float32)).T   # [D,H]
    wd2_t = w_d[:, d:].astype(jnp.float32).T                                # [D,H]
    b_fold = b_o.astype(jnp.float32) - b_d.astype(jnp.float32)              # [H]

    s_proj = feat32 @ w_fold                # [N,H] f32  self projection
    v_proj = feat32 @ wd2_t                 # [N,H] f32  tail-half projection

    # Lane-dense padding; reserve one padded column of V for the all-ones
    # denominator column (hence h+1 before rounding up to 128).
    h_pad = ((h + 1 + 127) // 128) * 128
    denom_col = h

    # ---- row-block tiling (full adj rows per tile -> softmax is exact) ----
    tm = max(16, (min(block_rows, max(n, 16)) // 16) * 16)
    if n // tm < min_grid_steps and n >= min_grid_steps * 16:
        tm = max(16, ((n // min_grid_steps) // 16) * 16)      # keep >= ~8 grid steps

    vmem_cap = _vmem_capacity_bytes()
    vmem_budget = int(0.85 * vmem_cap)

    def vmem_bytes(tm_):
        streamed = 2 * (tm_ * n * 4 + tm_ * h_pad * 4 + tm_ * h_pad * 2)  # dbl-buffered
        resident = 2 * (n * h_pad * 2) + 2 * h_pad * 4                    # V + bias
        interm = 4 * tm_ * n * 4                                          # f32 [tm,n] scratch
        return streamed + resident + interm

    while tm > 16 and vmem_bytes(tm) > vmem_budget:
        tm -= 16

    n_pad = pl.cdiv(n, tm) * tm
    grid = (n_pad // tm,)

    # ---- kernel operands (adj streamed as f32: no O(N^2) wrapper cast) ----
    adj_rows = jnp.pad(adj_matrix.astype(jnp.float32), ((0, n_pad - n), (0, 0)))
    s_rows = jnp.pad(s_proj, ((0, n_pad - n), (0, h_pad - h)))              # f32
    v_full = jnp.pad(v_proj.astype(jnp.bfloat16), ((0, 0), (0, h_pad - h)))
    v_full = v_full.at[:, denom_col].set(jnp.ones((n,), jnp.bfloat16))      # ones col
    b_row = jnp.pad(b_fold, (0, h_pad - h)).reshape(1, h_pad)               # f32

    cost = pl.CostEstimate(
        flops=2 * n_pad * n * h_pad + 8 * n_pad * n + 4 * n_pad * h_pad,
        transcendentals=n_pad * n + n_pad * h_pad,
        bytes_accessed=(n_pad * n * 4 + n_pad * h_pad * 4 + n * h_pad * 2
                        + h_pad * 4 + n_pad * h_pad * 2),
    )

    vmem_limit = int(min(vmem_budget, max(2 * vmem_bytes(tm), 32 << 20)))

    kernel = functools.partial(_graph_distill_kernel, denom_col=denom_col,
                               use_bf16_exp=_bf16_eup_available())

    out_padded = pl.pallas_call(
        kernel,
        out_shape=jax.ShapeDtypeStruct((n_pad, h_pad), jnp.bfloat16),
        grid=grid,
        in_specs=[
            pl.BlockSpec((tm, n), lambda i: (i, 0)),          # adj row tile (f32)
            pl.BlockSpec((tm, h_pad), lambda i: (i, 0)),      # folded self proj (f32)
            pl.BlockSpec((n, h_pad), lambda i: (0, 0)),       # V = feat@Wd_tail (bf16, +ones)
            pl.BlockSpec((1, h_pad), lambda i: (0, 0)),       # folded bias (f32)
        ],
        out_specs=pl.BlockSpec((tm, h_pad), lambda i: (i, 0)),
        compiler_params=pltpu.CompilerParams(
            dimension_semantics=("parallel",),
            vmem_limit_bytes=vmem_limit),
        cost_estimate=cost,
    )(adj_rows, s_rows, v_full, b_row)

    out = out_padded[:n, :h].astype(jnp.float32)
    return out, out


def _reference(features, adj_matrix, params):
    """Pure-JAX reference mirroring the PyTorch forward literally (f32)."""
    w_d, b_d, w_o, b_o = params
    feat = features.astype(jnp.float32)
    adj = adj_matrix.astype(jnp.float32)
    n, d = feat.shape
    head = jnp.repeat(feat[:, None, :], n, axis=1)
    tail = jnp.repeat(feat[None, :, :], n, axis=0)
    neigh = jnp.concatenate([head, tail], axis=-1)            # [N, N, 2D]
    mask = 1.0 - jnp.eye(n, dtype=jnp.float32)
    logits = adj * 5.0 + (1.0 - mask) * -1e32
    adj_soft = jax.nn.softmax(logits, axis=-1)
    norm = jnp.sum(adj_soft[..., None] * neigh, axis=1)       # [N, 2D]
    neigh_feat = norm @ w_d.T + b_d
    out = (feat @ w_o.T + b_o) - neigh_feat
    return jnp.tanh(out)


if __name__ == "__main__":
    # Small shapes: node_num=512, input_dim=16, hidden_size=32
    N, D, H = 512, 16, 32
    key = jax.random.PRNGKey(0)
    k1, k2, k3, k4, k5, k6, k7 = jax.random.split(key, 7)

    features = jax.random.normal(k1, (N, D), jnp.float32)
    key_features = jax.random.normal(k2, (N, D), jnp.float32)
    adj_matrix = (jax.random.uniform(k3, (N, N)) > 0.5).astype(jnp.float32)

    # Deterministic parameter init (Linear(2D->H) and Linear(D->H))
    w_d = jax.random.normal(k4, (H, 2 * D), jnp.float32) * 0.1
    b_d = jax.random.normal(k5, (H,), jnp.float32) * 0.1
    w_o = jax.random.normal(k6, (H, D), jnp.float32) * 0.1
    b_o = jax.random.normal(k7, (H,), jnp.float32) * 0.1
    params = (w_d, b_d, w_o, b_o)

    # TODO(synk): withAgg=True branch not implemented — the PyTorch code calls
    # `self.activation(...)` (a bool) there, which would raise; default is False.
    out, out2 = graph_distill_forward(features, key_features, adj_matrix, params)
    out = jax.block_until_ready(out)

    ref = _reference(features, adj_matrix, params)
    max_err = float(jnp.max(jnp.abs(out - ref)))
    # bf16 MXU operands + bf16 output -> loosened tolerance vs f32 reference.
    assert jnp.allclose(out, ref, atol=3e-2, rtol=3e-2), \
        f"mismatch vs reference (max abs err {max_err})"
    print("KERNEL_OK")
</pallas_src>

<mosaic_0001>
module attributes {stable_mosaic.version = 11 : i64} {
  func.func @_graph_distill_kernel(%arg0: i32, %arg1: memref<64x512xf32, #tpu.memory_space<vmem>>, %arg2: memref<64x128xf32, #tpu.memory_space<vmem>>, %arg3: memref<512x128xbf16, #tpu.memory_space<vmem>>, %arg4: memref<1x128xf32, #tpu.memory_space<vmem>>, %arg5: memref<64x128xbf16, #tpu.memory_space<vmem>>) attributes {dimension_semantics = [#tpu.dimension_semantics<parallel>], iteration_bounds = array<i64: 8>, scalar_prefetch = 0 : i64, scratch_operands = 0 : i64, tpu.core_type = #tpu.core_type<tc>, window_params = [{transform_indices = @transform_0, window_bounds = array<i64: 64, 512>}, {transform_indices = @transform_1, window_bounds = array<i64: 64, 128>}, {pipeline_mode = #tpu.pipeline_mode<synchronous>, transform_indices = @transform_2, window_bounds = array<i64: 512, 128>}, {pipeline_mode = #tpu.pipeline_mode<synchronous>, transform_indices = @transform_3, window_bounds = array<i64: 1, 128>}, {transform_indices = @transform_4, window_bounds = array<i64: 64, 128>}]} {
    %c0 = arith.constant 0 : index
    %c0_0 = arith.constant 0 : index
    %0 = vector.load %arg1[%c0, %c0_0] : memref<64x512xf32, #tpu.memory_space<vmem>>, vector<64x512xf32>
    %c64_i32 = arith.constant 64 : i32
    %1 = arith.muli %arg0, %c64_i32 : i32
    %2 = tpu.iota {dimensions = array<i32: 0>} : vector<64x512xi32>
    %3 = tpu.iota {dimensions = array<i32: 1>} : vector<64x512xi32>
    %4 = vector.broadcast %1 : i32 to vector<64x512xi32>
    %5 = arith.addi %2, %4 : vector<64x512xi32>
    %6 = arith.cmpi eq, %5, %3 : vector<64x512xi32>
    %cst = arith.constant 5.000000e+00 : f32
    %7 = vector.broadcast %cst : f32 to vector<64x512xf32>
    %8 = arith.mulf %0, %7 : vector<64x512xf32>
    %cst_1 = arith.constant -1.000000e+30 : f32
    %9 = vector.broadcast %cst_1 : f32 to vector<64x512xf32>
    %10 = arith.select %6, %9, %8 : vector<64x512xi1>, vector<64x512xf32>
    %cst_2 = arith.constant dense<0xFF800000> : vector<64xf32>
    %11 = vector.multi_reduction <maximumf>, %10, %cst_2 [1] : vector<64x512xf32> to vector<64xf32>
    %12 = vector.shape_cast %11 : vector<64xf32> to vector<64x1xf32>
    %13 = vector.broadcast %12 : vector<64x1xf32> to vector<64x512xf32>
    %14 = arith.subf %10, %13 : vector<64x512xf32>
    %15 = arith.truncf %14 : vector<64x512xf32> to vector<64x512xbf16>
    %16 = math.exp %15 : vector<64x512xbf16>
    %c0_3 = arith.constant 0 : index
    %c0_4 = arith.constant 0 : index
    %17 = vector.load %arg3[%c0_3, %c0_4] : memref<512x128xbf16, #tpu.memory_space<vmem>>, vector<512x128xbf16>
    %cst_5 = arith.constant dense<0.000000e+00> : vector<64x128xf32>
    %18 = tpu.matmul %16, %17, %cst_5 {dimension_numbers = #tpu.dot_dimension_numbers<[1], [0], [0], [1], [0, 0, 1, 1], [], []>} : vector<64x512xbf16>, vector<512x128xbf16>, vector<64x128xf32> -> vector<64x128xf32>
    %19 = vector.extract_strided_slice %18 {offsets = [0, 32], sizes = [64, 1], strides = [1, 1]} : vector<64x128xf32> to vector<64x1xf32>
    %cst_6 = arith.constant 1.000000e+00 : f32
    %20 = vector.broadcast %cst_6 : f32 to vector<64x1xf32>
    %21 = arith.divf %20, %19 : vector<64x1xf32>
    %22 = vector.broadcast %21 : vector<64x1xf32> to vector<64x128xf32>
    %23 = arith.mulf %18, %22 : vector<64x128xf32>
    %c0_7 = arith.constant 0 : index
    %c0_8 = arith.constant 0 : index
    %24 = vector.load %arg2[%c0_7, %c0_8] : memref<64x128xf32, #tpu.memory_space<vmem>>, vector<64x128xf32>
    %c0_9 = arith.constant 0 : index
    %c0_10 = arith.constant 0 : index
    %25 = vector.load %arg4[%c0_9, %c0_10] : memref<1x128xf32, #tpu.memory_space<vmem>>, vector<1x128xf32>
    %26 = vector.broadcast %25 : vector<1x128xf32> to vector<64x128xf32>
    %27 = arith.addf %24, %26 : vector<64x128xf32>
    %28 = arith.subf %27, %23 : vector<64x128xf32>
    %29 = math.tanh %28 : vector<64x128xf32>
    %30 = arith.truncf %29 : vector<64x128xf32> to vector<64x128xbf16>
    %c0_11 = arith.constant 0 : index
    %c0_12 = arith.constant 0 : index
    %31 = vector.load %arg5[%c0_11, %c0_12] : memref<64x128xbf16, #tpu.memory_space<vmem>>, vector<64x128xbf16>
    tpu.vector_store %arg5[%c0_11, %c0_12], %30 {strides = array<i32>} : memref<64x128xbf16, #tpu.memory_space<vmem>>, vector<64x128xbf16>,
    return
  }
  func.func @transform_0(%arg0: i32) -> (i32, i32) {
    %c0_i32 = arith.constant 0 : i32
    %c0_i32_0 = arith.constant 0 : i32
    return %arg0, %c0_i32 : i32, i32
  }
  func.func @transform_1(%arg0: i32) -> (i32, i32) {
    %c0_i32 = arith.constant 0 : i32
    %c0_i32_0 = arith.constant 0 : i32
    return %arg0, %c0_i32 : i32, i32
  }
  func.func @transform_2(%arg0: i32) -> (i32, i32) {
    %c0_i32 = arith.constant 0 : i32
    %c0_i32_0 = arith.constant 0 : i32
    %c0_i32_1 = arith.constant 0 : i32
    return %c0_i32, %c0_i32_0 : i32, i32
  }
  func.func @transform_3(%arg0: i32) -> (i32, i32) {
    %c0_i32 = arith.constant 0 : i32
    %c0_i32_0 = arith.constant 0 : i32
    %c0_i32_1 = arith.constant 0 : i32
    return %c0_i32, %c0_i32_0 : i32, i32
  }
  func.func @transform_4(%arg0: i32) -> (i32, i32) {
    %c0_i32 = arith.constant 0 : i32
    %c0_i32_0 = arith.constant 0 : i32
    return %arg0, %c0_i32 : i32, i32
  }
}

</mosaic_0001>

<bundles_post_ra>
// kernel: tpu_custom_call.1
= control target key start
LH: loop header
LB: loop body
LE: loop exit
PB: predicated region body
PF: predicated region fallthrough
CT: control target
= control target key end

     0   :  { %s2309_s0 = inlined_call_operand.hbm [shape: f32[512,512], index: 0, kind: input, shape index: {}]   ;;  %s2310_s1 = inlined_call_operand.hbm [shape: f32[512,128], index: 1, kind: input, shape index: {}]   ;;  %s2311_s2 = inlined_call_operand.hbm [shape: bf16[512,128], index: 2, kind: input, shape index: {}]   ;;  %s2312_s3 = inlined_call_operand.vmem [shape: f32[1,128], index: 3, kind: input, shape index: {}]   ;;  %s2313_s4 = inlined_call_operand.hbm [shape: bf16[512,128], index: 4, kind: output, shape index: {}]  }
   0x1   :  { %2317 = sst [smem:[#allocation13_spill]] %s2309_s0 }
   0x2   :  { %2318 = sst [smem:[#allocation14_spill]] %s2311_s2 }
   0x3   :  { %9 = vsyncpa [#allocation3], 0 }
   0x4   :  { %11 = vsyncpa [#allocation3 + $0x1], 0 }
   0x5   :  { %12 = vsyncpa [#allocation6], 0 }
   0x6   :  { %14 = vsyncpa [#allocation6 + $0x1], 0 }
   0x7   :  { %15 = vsyncpa [#allocation4], 0 }
   0x8   :  { %17 = vsyncpa [#allocation4 + $0x1], 0  ;;  %s1752_s15 = smov 0   ;;  %s1754_s16 = smov 0  }
   0x9   :  { %s1756_s17 = smov 0   ;;  %s1758_s18 = smov 0  }
   0xa LB: > { %s1773_s19 = sadd.s32 4294967295, %s1712_s18   ;;  %s1211_s20 = sadd.s32 4294967294, %s1712_s18   ;;  %s1712_s18 = sphi %s1758_s18, %s2336_s18   ;;  %s1708_s17 = sphi %s1756_s17, %s2335_s17   ;;  %s1704_s16 = sphi %s1754_s16, %s2334_s16   ;;  %s1700_s15 = sphi %s1752_s15, %s2333_s15  }
   0xb   : > { %p43_p0 = scmp.ne.s32.totalorder %s1704_s16, %s1700_s15  ;;  %p2314_p1 = scmp.eq.s32.totalorder %s1773_s19, 0 }
   0xc   : > { %p141_p3 = scmp.eq.s32.totalorder %s1211_s20, 7  ;;  %p1212_p5 = scmp.ge.s32.totalorder %s1712_s18, 1 }
   0xd   : > { %p1782_p4 = por %p2314_p1, %p43_p0  ;;  %p148_p7 = scmp.lt.s32.totalorder %s1712_s18, 9 }
   0xe   : > { %p1787_p6 = por %p141_p3, %p43_p0  ;;  %s1714_s24 = smov [#allocation7]  }
   0xf   : > { %s2319_s21 = scalar_select %p1782_p4, 1, 0 }
  0x10   : > { %s2320_s22 = scalar_select %p1787_p6, 1, 0 }
  0x11   : > { %p1792_p8 = pnand %p1212_p5, %p148_p7  ;;  %s160_s25 = sshll.u32 %s1714_s24, 4  ;;  %s161_s25 = int_to_ptr.vmem [resolvable:$true] %s160_s25 }
  0x12   : > { %s1805_s27 = sadd.s32 1, %s1712_s18   ;;  %s30_s28 = sadd.s32 1, %s1708_s17 }
  0x13   : > { %p1399_p9 = pneg %p1792_p8  ;;  %s27_s29 = ssub.s32 %s1712_s18, %s1805_s27 }
  0x14   : > { %s1569_s30 = scalar_lea.vmem %s161_s25, 4096  ;;  %p1577_p3 = scmp.lt.s32.totalorder %s161_s25, %s161_s25 }
  0x15   : > { %p1800_p10 = pnand %p1399_p9, %p2314_p1  ;;  %p1570_p12 = scmp.ne.s32.totalorder %s161_s25, %s1569_s30 }
  0x16   : > { %p1578_p5 = scmp.lt.s32.totalorder %s1569_s30, %s1569_s30 }
  0x17   : > { %p1560_p11 = pneg %p1800_p10 }
  0x18   : > { %p1579_p7 = por %p1578_p5, %p1577_p3 }
  0x19   : > { %p1572_p13 = pnand %p1570_p12, %p1560_p11 }
  0x1b   : > { %p1573_p0 = pneg %p1572_p13 }
  0x1d   : > { %p1580_p2 = pnand %p1579_p7, %p1573_p0 }
  0x1f   : > { %1583 = shalt.err (!%p1580_p2)
}
  0x20   : > { %s1715_s5 = smov 64   ;;  %s1716_s6 = smov 4  }
  0x21   : > { %s2323_s2 = sld [smem:[#allocation14_spill]]  ;;  %p28_p9 = scmp.eq.s32.totalorder %s27_s29, 0 }
  0x22   : > { %p37_p11 = scmp.ne.s32.totalorder %s1708_s17, %s1704_s16  ;;  %p38_p12 = scmp.eq.s32.totalorder %s1712_s18, 0 }
  0x23   : > { %p1415_p2 = scmp.lt.s32.totalorder %s1712_s18, 8  ;;  %p2324_p0 = scmp.eq.s32.totalorder %s1773_s19, 7 }
  0x24   : > { %s1822_s9 = scalar_select %p28_p9, %s1708_s17, %s30_s28  }
  0x25   : > { %p39_p13 = por %p38_p12, %p37_p11  ;;  %p1826_p3 = por %p2324_p0, %p37_p11 }
  0x26   : > { %s1831_s11 = sand.u32 1, %s1708_s17   ;;  %s1275_s12 = sshll.u32 %s1712_s18, 12 }
  0x27   : > { %1402 = dma.hbm_to_vmem [thread:$0]  (!%p1800_p10), %s2323_s2, 4096, %s161_s25, [#allocation6], %s1715_s5, %s1715_s5, %s1716_s6  }
  0x28   : > { %s2325_s10 = scalar_select %p1826_p3, 1, 0 }
  0x29   : > { %s1215_s13 = sshll.u32 %s1831_s11, 8  ;;  %s2326_s0 = sld [smem:[#allocation13_spill]] }
  0x2a   : > { %s181_s25 = scalar_lea.vmem [#allocation2], %s1215_s13  ;;  %p1840_p10 = pnand %p1415_p2, %p39_p13 }
  0x2b   : > { %s189_s26 = sshll.u32 %s181_s25, 4  ;;  %s178_s29 = scalar_lea.sflag [#allocation3], %s1831_s11  ;;  %s1844_s26 = int_to_ptr.vmem [resolvable:$true] %s189_s26 }
  0x2c   : > { %p1586_p7 = pneg %p1840_p10 }
  0x2f   : > { %s1838_s24 = scalar_lea.hbm %s2326_s0, %s1275_s12  ;;  %s1589_s7 = scalar_lea.hbm %s2326_s0, 32768 }
  0x30   : > { %s1584_s30 = scalar_lea.hbm %s1838_s24, 4096  ;;  %p1590_p12 = scmp.lt.s32.totalorder %s1838_s24, %s2326_s0 }
  0x31   : > { %p1585_p5 = scmp.ne.s32.totalorder %s1838_s24, %s1584_s30  ;;  %p1591_p2 = scmp.lt.s32.totalorder %s1589_s7, %s1584_s30 }
  0x33   : > { %p1587_p9 = pnand %p1586_p7, %p1585_p5  ;;  %p1592_p13 = por %p1591_p2, %p1590_p12 }
  0x35   : > { %p1588_p11 = pneg %p1587_p9 }
  0x37   : > { %p1593_p0 = pnand %p1592_p13, %p1588_p11 }
  0x39   : > { %1596 = shalt.err (!%p1593_p0)
}
  0x3a   : > { %s1597_s13 = scalar_lea.vmem %s1844_s26, 4096  ;;  %s1717_s14 = smov [#allocation2]  }
  0x3b   : > { %p1598_p1 = scmp.ne.s32.totalorder %s1844_s26, %s1597_s13  ;;  %s1602_s20 = sshll.u32 %s1717_s14, 4  ;;  %s1603_s20 = int_to_ptr.vmem [resolvable:$false] %s1602_s20 }
  0x3c   : > { %s1604_s25 = scalar_lea.vmem %s1603_s20, 8192  ;;  %p1605_p6 = scmp.lt.s32.totalorder %s1844_s26, %s1603_s20 }
  0x3d   : > { %p1600_p5 = pnand %p1598_p1, %p1586_p7  ;;  %p1606_p3 = scmp.lt.s32.totalorder %s1604_s25, %s1597_s13 }
  0x3f   : > { %p1601_p9 = pneg %p1600_p5  ;;  %p1607_p4 = por %p1606_p3, %p1605_p6 }
  0x41   : > { %p1608_p12 = pnand %p1607_p4, %p1601_p9 }
  0x43   : > { %1611 = shalt.err (!%p1608_p12)
}
  0x44   : > { %s1718_s30 = smov 512   ;;  %s1719_s5 = smov 32  }
  0x45   : > { %1406 = dma.hbm_to_vmem [thread:$0]  (!%p1840_p10), %s1838_s24, 4096, %s1844_s26, %s178_s29, %s1718_s30, %s1718_s30, %s1719_s5  }
  0x46   : > { %s199_s6 = sand.u32 1, %s1712_s18   ;;  %s1219_s7 = sshll.u32 %s1831_s11, 6 }
  0x47   : > { %s1276_s8 = sshll.u32 %s1712_s18, 10  ;;  %s203_s12 = scalar_lea.vmem [#allocation5], %s1219_s7 }
  0x48   : > { %s210_s13 = sshll.u32 %s203_s12, 4  ;;  %s1879_s25 = scalar_lea.hbm %s2310_s1, %s1276_s8  ;;  %s1881_s13 = int_to_ptr.vmem [resolvable:$true] %s210_s13 }
  0x49   : > { %s1883_s0 = scalar_lea.sflag [#allocation6], %s199_s6  ;;  %s1612_s2 = scalar_lea.hbm %s1879_s25, 1024 }
  0x4a   : > { %p1613_p1 = scmp.ne.s32.totalorder %s1879_s25, %s1612_s2  ;;  %s1617_s26 = scalar_lea.hbm %s2310_s1, 8192 }
  0x4b   : > { %p1618_p3 = scmp.lt.s32.totalorder %s1879_s25, %s2310_s1  ;;  %p1619_p11 = scmp.lt.s32.totalorder %s1617_s26, %s1612_s2 }
  0x4c   : > { %p1615_p4 = pnand %p1613_p1, %p1586_p7 }
  0x4d   : > { %p1620_p2 = por %p1619_p11, %p1618_p3 }
  0x4e   : > { %p1616_p6 = pneg %p1615_p4 }
  0x50   : > { %p1621_p13 = pnand %p1620_p2, %p1616_p6 }
  0x52   : > { %1624 = shalt.err (!%p1621_p13)
}
  0x53   : > { %s1625_s5 = scalar_lea.vmem %s1881_s13, 1024  ;;  %s1720_s6 = smov [#allocation5]  }
  0x54   : > { %p1626_p0 = scmp.ne.s32.totalorder %s1881_s13, %s1625_s5  ;;  %s1630_s7 = sshll.u32 %s1720_s6, 4  ;;  %s1631_s7 = int_to_ptr.vmem [resolvable:$false] %s1630_s7 }
  0x55   : > { %s1632_s8 = scalar_lea.vmem %s1631_s7, 2048  ;;  %p1633_p12 = scmp.lt.s32.totalorder %s1881_s13, %s1631_s7 }
  0x56   : > { %p1628_p5 = pnand %p1626_p0, %p1586_p7  ;;  %p1634_p1 = scmp.lt.s32.totalorder %s1632_s8, %s1625_s5 }
  0x58   : > { %p1629_p9 = pneg %p1628_p5  ;;  %p1635_p4 = por %p1634_p1, %p1633_p12 }
  0x5a   : > { %p1636_p3 = pnand %p1635_p4, %p1629_p9 }
  0x5c   : > { %1639 = shalt.err (!%p1636_p3)
}
  0x5d   : > { %s1721_s2 = smov 128   ;;  %s1722_s12 = smov 8  }
  0x5e   : > { %1409 = dma.hbm_to_vmem [thread:$0]  (!%p1840_p10), %s1879_s25, 1024, %s1881_s13, %s1883_s0, %s1721_s2, %s1721_s2, %s1722_s12  }
  0x5f   : > { %222 = sbr.rel (%p1792_p8) target bundleno = 695 (0x2b7), region = 36  ;;  %s1911_s14 = sand.u32 (!%p1792_p8), 1, %s1704_s16  }
  0x60   : > { %s1223_s20 = sshll.u32 (!%p1792_p8), %s1911_s14, 8  ;;  %s225_s11 = scalar_lea.sflag (!%p1792_p8), [#allocation3], %s1911_s14 }
  0x61   : > { %s1915_s24 = scalar_lea.vmem (!%p1792_p8), [#allocation2], %s1223_s20  ;;  %p2328_p7 = scmp.ne.s32.totalorder (!%p1792_p8), %s2319_s21, 0 }
  0x64   : > { %1683 = dma.done.wait (%p2328_p7), %s225_s11, 4096  }
  0x65   : > { %1685 = vsyncadd (%p2328_p7), %s225_s11, 4294963200  ;;  %s233_s0 = sand.u32 1, %s1773_s19   ;;  %s1224_s23 = sshll.u32 %s1911_s14, 6 }
  0x66   : > { %s234_s28 = scalar_lea.sflag [#allocation6], %s233_s0  ;;  %s1923_s13 = scalar_lea.vmem [#allocation5], %s1224_s23 }
  0x67   : > { %1687 = dma.done.wait (%p2328_p7), %s234_s28, 1024  }
  0x68   : > { %1689 = vsyncadd (%p2328_p7), %s234_s28, 4294966272  ;;  %p2329_p8 = scmp.eq.s32.totalorder %s1773_s19, 0 }
  0x6a   : > { %1691 = dma.done.wait (%p2329_p8), [#allocation6], 4096   ;;  %p2330_p10 = pmov %p2329_p8 }
  0x6b   : > { %s1227_s25 = sshll.u32 %s1773_s19, 6  ;;  %v308_v0 = vlaneseq  ;;  %v275_v12 = vld [vmem:[%s1915_s24] sm:$0xff]  ;;  %v276_v13 = vld [vmem:[%s1915_s24 + $0x8] sm:$0xff]  ;;  %v277_v14 = vld [vmem:[%s1915_s24 + $0x10] sm:$0xff]  ;;  %s1226_s29 = sshll.u32 %s1911_s14, 5 }
  0x6c   : > { %1693 = vsyncadd (%p2330_p10), [#allocation6], 4294963200  ;;  %v1934_v1 = vstv %s1227_s25  ;;  %v278_v18 = vld [vmem:[%s1915_s24 + $0x18] sm:$0xff]  ;;  %v363_v19 = vmul.f32 5.0, %v275_v12  ;;  %v364_v20 = vmul.f32 5.0, %v276_v13  ;;  %v365_v21 = vmul.f32 5.0, %v277_v14 }
  0x6d   : > { %v1936_v2 = vshrl.u32 %v308_v0, 7  ;;  %v1938_v3 = vand.u32 127, %v308_v0  ;;  %v283_v22 = vld [vmem:[%s1915_s24 + $0x40] sm:$0xff]  ;;  %v284_v23 = vld [vmem:[%s1915_s24 + $0x48] sm:$0xff]  ;;  %v366_v25 = vmul.f32 5.0, %v278_v18  ;;  %v285_v26 = vld [vmem:[%s1915_s24 + $0x50] sm:$0xff] }
  0x6e   : > { %v286_v27 = vld [vmem:[%s1915_s24 + $0x58] sm:$0xff]  ;;  %v371_v33 = vmul.f32 5.0, %v283_v22  ;;  %v372_v34 = vmul.f32 5.0, %v284_v23  ;;  %v373_v35 = vmul.f32 5.0, %v285_v26  ;;  %v279_v37 = vld [vmem:[%s1915_s24 + $0x20] sm:$0xff]  ;;  %v280_v38 = vld [vmem:[%s1915_s24 + $0x28] sm:$0xff] }
  0x6f   : > { %v1941_v4 = vadd.s32 128, %v1938_v3  ;;  %v1944_v5 = vadd.s32 256, %v1938_v3  ;;  %v1947_v6 = vadd.s32 384, %v1938_v3  ;;  %v323_v7 = vadd.s32 %v1934_v1, %v1936_v2  ;;  %v281_v39 = vld [vmem:[%s1915_s24 + $0x30] sm:$0xff]  ;;  %v282_v43 = vld [vmem:[%s1915_s24 + $0x38] sm:$0xff]  ;;  %v287_v51 = vld [vmem:[%s1915_s24 + $0x60] sm:$0xff] }
  0x70   : > { %v311_v8 = vadd.s32 16, %v1936_v2  ;;  %v310_v9 = vadd.s32 8, %v1936_v2  ;;  %v312_v10 = vadd.s32 24, %v1936_v2  ;;  %v314_v11 = vadd.s32 40, %v1936_v2  ;;  %v288_v54 = vld [vmem:[%s1915_s24 + $0x68] sm:$0xff]  ;;  %v289_v55 = vld [vmem:[%s1915_s24 + $0x70] sm:$0xff] }
  0x71   : > { %vm331_vm0 = vcmp.eq.s32.totalorder %v323_v7, %v1938_v3  ;;  %vm332_vm1 = vcmp.eq.s32.totalorder %v323_v7, %v1941_v4  ;;  %vm333_vm2 = vcmp.eq.s32.totalorder %v323_v7, %v1944_v5  ;;  %vm334_vm3 = vcmp.eq.s32.totalorder %v323_v7, %v1947_v6  ;;  %v290_v56 = vld [vmem:[%s1915_s24 + $0x78] sm:$0xff]  ;;  %v295_v63 = vld [vmem:[%s1915_s24 + $0xa0] sm:$0xff]  ;;  %s270_s30 = scalar_lea.vmem [#allocation8], %s1226_s29  ;;  %s1285_s5 = sshll.u32 %s1773_s19, 9 }
  0x72   : > { %v325_v15 = vadd.s32 %v1934_v1, %v311_v8  ;;  %v324_v16 = vadd.s32 %v1934_v1, %v310_v9  ;;  %v1965_v17 = vadd.s32 %v1934_v1, %v312_v10  ;;  %v1971_v24 = vadd.s32 %v1934_v1, %v314_v11  ;;  %v296_v10 = vld [vmem:[%s1915_s24 + $0xa8] sm:$0xff]  ;;  %v297_v11 = vld [vmem:[%s1915_s24 + $0xb0] sm:$0xff]  ;;  %v298_v13 = vld [vmem:[%s1915_s24 + $0xb8] sm:$0xff]  ;;  %s1106_s6 = sshll.u32 %s270_s30, 4  ;;  %s2265_s2 = scalar_lea.hbm %s2313_s4, %s1285_s5  ;;  %s2267_s6 = int_to_ptr.vmem [resolvable:$true] %s1106_s6 }
  0x73   : > { %v1980_v28 = vsel %vm331_vm0, -1e+30, %v363_v19  ;;  %v1984_v29 = vsel %vm332_vm1, -1e+30, %v364_v20  ;;  %v1988_v30 = vsel %vm333_vm2, -1e+30, %v365_v21 }
  0x74   : > { %vm339_vm4 = vcmp.eq.s32.totalorder %v325_v15, %v1938_v3  ;;  %vm340_vm5 = vcmp.eq.s32.totalorder %v325_v15, %v1941_v4  ;;  %vm341_vm6 = vcmp.eq.s32.totalorder %v325_v15, %v1944_v5  ;;  %vm342_vm7 = vcmp.eq.s32.totalorder %v325_v15, %v1947_v6  ;;  %v291_v14 = vld [vmem:[%s1915_s24 + $0x80] sm:$0xff]  ;;  %v292_v15 = vld [vmem:[%s1915_s24 + $0x88] sm:$0xff]  ;;  %v293_v20 = vld [vmem:[%s1915_s24 + $0x90] sm:$0xff]  ;;  %s1093_s12 = scalar_lea.sflag [#allocation4], %s1911_s14  ;;  %s1640_s20 = scalar_lea.vmem %s2267_s6, 512 }
  0x75   : > { %v1993_v31 = vsel %vm334_vm3, -1e+30, %v366_v25  ;;  %v427_v32 = vmax.f32 %v1980_v28, %v1984_v29  ;;  %v374_v36 = vmul.f32 5.0, %v286_v27  ;;  %vm335_vm8 = vcmp.eq.s32.totalorder %v324_v16, %v1938_v3  ;;  %v294_v21 = vld [vmem:[%s1915_s24 + $0x98] sm:$0xff]  ;;  %p1641_p6 = scmp.ne.s32.totalorder %s2267_s6, %s1640_s20  ;;  %p2331_p11 = scmp.ne.s32.totalorder %s2325_s10, 0 }
  0x76   : > { %vm336_vm9 = vcmp.eq.s32.totalorder %v324_v16, %v1941_v4  ;;  %v2005_v41 = vsel %vm339_vm4, -1e+30, %v371_v33  ;;  %v2009_v42 = vsel %vm340_vm5, -1e+30, %v372_v34  ;;  %vm337_vm10 = vcmp.eq.s32.totalorder %v324_v16, %v1944_v5  ;;  %v1462_v27 = vld [vmem:[#allocation7 + $0x78] sm:$0xff]   ;;  %s1724_s19 = smov [#allocation8]  }
  0x77   : > { %v428_v40 = vmax.f32 %v427_v32, %v1988_v30  ;;  %v2015_v44 = vsel %vm341_vm6, -1e+30, %v373_v35  ;;  %v2019_v45 = vsel %vm342_vm7, -1e+30, %v374_v36  ;;  %v437_v46 = vmax.f32 %v2005_v41, %v2009_v42  ;;  %1309 = vmatprep.subr.bf16.mxu0 %v1462_v27  ;;  %p1642_p2 = pnand %p1641_p6, %p2331_p11  ;;  %s1644_s11 = sshll.u32 %s1724_s19, 4  ;;  %s1645_s11 = int_to_ptr.vmem [resolvable:$false] %s1644_s11 }
  0x78   : > { %vm338_vm11 = vcmp.eq.s32.totalorder %v324_v16, %v1947_v6  ;;  %v367_v48 = vmul.f32 5.0, %v279_v37  ;;  %v368_v49 = vmul.f32 5.0, %v280_v38  ;;  %v369_v50 = vmul.f32 5.0, %v281_v39  ;;  %v303_v39 = vld [vmem:[%s1915_s24 + $0xe0] sm:$0xff]  ;;  %p1647_p0 = scmp.lt.s32.totalorder %s2267_s6, %s1645_s11 }
  0x79   : > { %v429_v47 = vmax.f32 %v428_v40, %v1993_v31  ;;  %v438_v52 = vmax.f32 %v437_v46, %v2015_v44  ;;  %v370_v53 = vmul.f32 5.0, %v282_v43  ;;  %vm343_vm12 = vcmp.eq.s32.totalorder %v1965_v17, %v1938_v3  ;;  %p1643_p13 = pneg %p1642_p2 }
  0x7a   : > { %vm344_vm13 = vcmp.eq.s32.totalorder %v1965_v17, %v1941_v4  ;;  %v2036_v57 = vsel %vm335_vm8, -1e+30, %v367_v48  ;;  %v2040_v58 = vsel %vm336_vm9, -1e+30, %v368_v49  ;;  %v2044_v59 = vsel %vm337_vm10, -1e+30, %v369_v50 }
  0x7b   : > { %430 = vmax.xlane.f32.xlu0 %v429_v47  ;;  %vm345_vm14 = vcmp.eq.s32.totalorder %v1965_v17, %v1944_v5  ;;  %v439_v60 = vmax.f32 %v438_v52, %v2019_v45  ;;  %v2051_v61 = vsel %vm338_vm11, -1e+30, %v370_v53  ;;  %v432_v62 = vmax.f32 %v2036_v57, %v2040_v58  ;;  %v304_v48 = vld [vmem:[%s1915_s24 + $0xe8] sm:$0xff]  ;;  %v305_v49 = vld [vmem:[%s1915_s24 + $0xf0] sm:$0xff]  ;;  %v306_v50 = vld [vmem:[%s1915_s24 + $0xf8] sm:$0xff] }
  0x7c   : > { %vm346_vm15 = vcmp.eq.s32.totalorder %v1965_v17, %v1947_v6  ;;  %v375_v0 = vmul.f32 5.0, %v287_v51  ;;  %v376_v7 = vmul.f32 5.0, %v288_v54  ;;  %v377_v8 = vmul.f32 5.0, %v289_v55  ;;  %v299_v55 = vld [vmem:[%s1915_s24 + $0xc0] sm:$0xff] }
  0x7d   : > { %v378_v9 = vmul.f32 5.0, %v290_v56  ;;  %440 = vmax.xlane.f32.xlu1 %v439_v60  ;;  %v433_v12 = vmax.f32 %v432_v62, %v2044_v59  ;;  %vm351_vm0 = vcmp.eq.s32.totalorder %v1971_v24, %v1938_v3  ;;  %vm352_vm1 = vcmp.eq.s32.totalorder %v1971_v24, %v1941_v4  ;;  %v1463_v56 = vld [vmem:[#allocation7 + $0xf8] sm:$0xff]   ;;  %v300_v60 = vld [vmem:[%s1915_s24 + $0xc8] sm:$0xff]  ;;  %v301_v62 = vld [vmem:[%s1915_s24 + $0xd0] sm:$0xff] }
  0x7e   : > { %vm353_vm2 = vcmp.eq.s32.totalorder %v1971_v24, %v1944_v5  ;;  %v2073_v16 = vsel %vm343_vm12, -1e+30, %v375_v0  ;;  %v2078_v18 = vsel %vm344_vm13, -1e+30, %v376_v7  ;;  %v2083_v19 = vsel %vm345_vm14, -1e+30, %v377_v8  ;;  %1349 = vmatprep.subr.bf16.mxu1 %v1463_v56 }
  0x7f   : > { %vm354_vm3 = vcmp.eq.s32.totalorder %v1971_v24, %v1947_v6  ;;  %v434_v22 = vmax.f32 %v433_v12, %v2051_v61  ;;  %v2093_v23 = vsel %vm346_vm15, -1e+30, %v378_v9  ;;  %v442_v25 = vmax.f32 %v2073_v16, %v2078_v18  ;;  %v1464_v24 = vld [vmem:[#allocation7 + $0x38] sm:$0xff]  }
  0x80   : > { %v383_v26 = vmul.f32 5.0, %v295_v63  ;;  %v384_v32 = vmul.f32 5.0, %v296_v10  ;;  %v385_v33 = vmul.f32 5.0, %v297_v11  ;;  %v386_v34 = vmul.f32 5.0, %v298_v13  ;;  %v302_v63 = vld [vmem:[%s1915_s24 + $0xd8] sm:$0xff]  ;;  %1310 = vmatpush3.bf16.msra.mxu0 %v1464_v24  ;;  %s1646_s24 = scalar_lea.vmem %s1645_s11, 1024 }
  0x81   : > { %v313_v35 = vadd.s32 32, %v1936_v2  ;;  %435 = vmax.xlane.f32.xlu0 %v434_v22  ;;  %v443_v36 = vmax.f32 %v442_v25, %v2083_v19  ;;  %v379_v37 = vmul.f32 5.0, %v291_v14  ;;  %v380_v38 = vmul.f32 5.0, %v292_v15  ;;  %v1465_v22 = vld [vmem:[#allocation7 + $0xb8] sm:$0xff]   ;;  %p1648_p5 = scmp.lt.s32.totalorder %s1646_s24, %s1640_s20 }
  0x82   : > { %v2102_v17 = vsel %vm351_vm0, -1e+30, %v383_v26  ;;  %v2108_v40 = vsel %vm352_vm1, -1e+30, %v384_v32  ;;  %v2113_v43 = vsel %vm353_vm2, -1e+30, %v385_v33  ;;  %1350 = vmatpush3.bf16.msra.mxu1 %v1465_v22 }
  0x83   : > { %v2118_v46 = vsel %vm354_vm3, -1e+30, %v386_v34  ;;  %v327_v47 = vadd.s32 %v1934_v1, %v313_v35  ;;  %v444_v51 = vmax.f32 %v443_v36, %v2093_v23  ;;  %v452_v52 = vmax.f32 %v2102_v17, %v2108_v40  ;;  %v1466_v33 = vld [vmem:[#allocation7 + $0x70] sm:$0xff]   ;;  %p1649_p9 = por %p1648_p5, %p1647_p0 }
  0x84   : > { %v381_v53 = vmul.f32 5.0, %v293_v20  ;;  %v382_v54 = vmul.f32 5.0, %v294_v21  ;;  %v316_v12 = vadd.s32 56, %v1936_v2  ;;  %v391_v13 = vmul.f32 5.0, %v303_v39  ;;  %v1467_v34 = vld [vmem:[#allocation7 + $0xf0] sm:$0xff]   ;;  %1311 = vmatprep.subr.bf16.mxu0 %v1466_v33  ;;  %v1487_v33 = vld [vmem:[#allocation7 + $0xc8] sm:$0xff]  }
  0x85   : > { %vm347_vm4 = vcmp.eq.s32.totalorder %v327_v47, %v1938_v3  ;;  %vm348_vm5 = vcmp.eq.s32.totalorder %v327_v47, %v1941_v4  ;;  %vm349_vm6 = vcmp.eq.s32.totalorder %v327_v47, %v1944_v5  ;;  %vm350_vm7 = vcmp.eq.s32.totalorder %v327_v47, %v1947_v6  ;;  %445 = vmax.xlane.f32.xlu1 %v444_v51  ;;  %v1482_v22 = vld [vmem:[#allocation7 + $0x50] sm:$0xff]   ;;  %p1650_p12 = pnand %p1649_p9, %p1643_p13 }
  0x86   : > { %v453_v0 = vmax.f32 %v452_v52, %v2113_v43  ;;  %v2136_v7 = vsel %vm347_vm4, -1e+30, %v379_v37  ;;  %v2138_v8 = vsel %vm348_vm5, -1e+30, %v380_v38  ;;  %v2140_v9 = vsel %vm349_vm6, -1e+30, %v381_v53  ;;  %1351 = vmatprep.subr.bf16.mxu1 %v1467_v34 }
  0x87   : > { %v2142_v10 = vsel %vm350_vm7, -1e+30, %v382_v54  ;;  %v447_v11 = vmax.f32 %v2136_v7, %v2138_v8  ;;  %v392_v15 = vmul.f32 5.0, %v304_v48  ;;  %v393_v20 = vmul.f32 5.0, %v305_v49  ;;  %v1468_v38 = vld [vmem:[#allocation7 + $0x30] sm:$0xff]   ;;  %v1470_v54 = vld [vmem:[#allocation7 + $0x68] sm:$0xff]  }
  0x88   : > { %v454_v14 = vmax.f32 %v453_v0, %v2118_v46  ;;  %v394_v21 = vmul.f32 5.0, %v306_v50  ;;  %v330_v26 = vadd.s32 %v1934_v1, %v316_v12  ;;  %v315_v27 = vadd.s32 48, %v1936_v2  ;;  %1312 = vmatpush3.bf16.msra.mxu0 %v1468_v38  ;;  %v1469_v52 = vld [vmem:[#allocation7 + $0xb0] sm:$0xff]   ;;  %v1476_v12 = vld [vmem:[#allocation7 + $0x20] sm:$0xff]   ;;  %v1488_v34 = vld [vmem:[#allocation7 + $0x8] sm:$0xff]  }
  0x89   : > { %v448_v25 = vmax.f32 %v447_v11, %v2140_v9  ;;  %v387_v32 = vmul.f32 5.0, %v299_v55  ;;  %v388_v35 = vmul.f32 5.0, %v300_v60  ;;  %v389_v36 = vmul.f32 5.0, %v301_v62  ;;  %1352 = vmatpush3.bf16.msra.mxu1 %v1469_v52  ;;  %1313 = vmatprep.subr.bf16.mxu0 %v1470_v54  ;;  %v1473_v62 = vld [vmem:[#allocation7 + $0xa8] sm:$0xff]   ;;  %v1475_v11 = vld [vmem:[#allocation7 + $0xe0] sm:$0xff]  }
  0x8a   : > { %455 = vmax.xlane.f32.xlu1 %v454_v14  ;;  %v390_v37 = vmul.f32 5.0, %v302_v63  ;;  %vm359_vm8 = vcmp.eq.s32.totalorder %v330_v26, %v1938_v3  ;;  %vm360_vm9 = vcmp.eq.s32.totalorder %v330_v26, %v1941_v4  ;;  %vm361_vm10 = vcmp.eq.s32.totalorder %v330_v26, %v1944_v5  ;;  %v1474_v63 = vld [vmem:[#allocation7 + $0x60] sm:$0xff]   ;;  %v1478_v14 = vld [vmem:[#allocation7 + $0x58] sm:$0xff]  }
  0x8b   : > { %v449_v39 = vmax.f32 %v448_v25, %v2142_v10  ;;  %vm362_vm11 = vcmp.eq.s32.totalorder %v330_v26, %v1947_v6  ;;  %v2156_v2 = vsel %vm359_vm8, -1e+30, %v391_v13  ;;  %v2158_v47 = vsel %vm360_vm9, -1e+30, %v392_v15  ;;  %v1477_v13 = vld [vmem:[#allocation7 + $0xa0] sm:$0xff]   ;;  %v1479_v15 = vld [vmem:[#allocation7 + $0xd8] sm:$0xff]  }
  0x8c   : > { %v2160_v48 = vsel %vm361_vm10, -1e+30, %v393_v20  ;;  %v2162_v49 = vsel %vm362_vm11, -1e+30, %v394_v21  ;;  %v462_v50 = vmax.f32 %v2156_v2, %v2158_v47  ;;  %v329_v51 = vadd.s32 %v1934_v1, %v315_v27  ;;  %v1480_v20 = vld [vmem:[#allocation7 + $0x18] sm:$0xff]   ;;  %v1483_v25 = vld [vmem:[#allocation7 + $0xd0] sm:$0xff]  }
  0x8d   : > { %450 = vmax.xlane.f32.xlu0 %v449_v39  ;;  %v1481_v21 = vld [vmem:[#allocation7 + $0x98] sm:$0xff]   ;;  %v1484_v26 = vld [vmem:[#allocation7 + $0x10] sm:$0xff]   ;;  %v1492_v38 = vld [vmem:[#allocation7] sm:$0xff]  }
  0x8e   : > { %v463_v53 = vmax.f32 %v462_v50, %v2160_v48  ;;  %vm355_vm12 = vcmp.eq.s32.totalorder %v329_v51, %v1938_v3  ;;  %vm356_vm13 = vcmp.eq.s32.totalorder %v329_v51, %v1941_v4  ;;  %vm357_vm14 = vcmp.eq.s32.totalorder %v329_v51, %v1944_v5  ;;  %v1471_v4 = vld [vmem:[#allocation7 + $0xe8] sm:$0xff]   ;;  %v1485_v27 = vld [vmem:[#allocation7 + $0x90] sm:$0xff]   ;;  %v1493_v39 = vld [vmem:[#allocation7 + $0x80] sm:$0xff]  }
  0x8f   : > { %vm358_vm15 = vcmp.eq.s32.totalorder %v329_v51, %v1947_v6  ;;  %v2172_v55 = vsel %vm355_vm12, -1e+30, %v387_v32  ;;  %v2174_v56 = vsel %vm356_vm13, -1e+30, %v388_v35  ;;  %v2176_v24 = vsel %vm357_vm14, -1e+30, %v389_v36  ;;  %1353 = vmatprep.subr.bf16.mxu1 %v1471_v4 }
  0x90   : > { %v464_v1 = vmax.f32 %v463_v53, %v2162_v49  ;;  %v2179_v60 = vsel %vm358_vm15, -1e+30, %v390_v37  ;;  %v457_v3 = vmax.f32 %v2172_v55, %v2174_v56  ;;  %v1472_v5 = vld [vmem:[#allocation7 + $0x28] sm:$0xff]   ;;  %1354 = vmatpush3.bf16.msra.mxu1 %v1473_v62  ;;  %v1490_v36 = vld [vmem:[#allocation7 + $0x40] sm:$0xff]  }
  0x91   : > { %1314 = vmatpush3.bf16.msra.mxu0 %v1472_v5  ;;  %1355 = vmatprep.subr.bf16.mxu1 %v1475_v11  ;;  %v1486_v32 = vld [vmem:[#allocation7 + $0x48] sm:$0xff]   ;;  %v1491_v37 = vld [vmem:[#allocation7 + $0xc0] sm:$0xff]  }
  0x92   : > { %465 = vmax.xlane.f32.xlu1 %v464_v1  ;;  %v458_v6 = vmax.f32 %v457_v3, %v2176_v24  ;;  %1315 = vmatprep.subr.bf16.mxu0 %v1474_v63  ;;  %v1489_v35 = vld [vmem:[#allocation7 + $0x88] sm:$0xff]  }
  0x94   : > { %v459_v0 = vmax.f32 %v458_v6, %v2179_v60  ;;  %1356 = vmatpush3.bf16.msra.mxu1 %v1477_v13 }
  0x95   : > { %1316 = vmatpush3.bf16.msra.mxu0 %v1476_v12  ;;  %1357 = vmatprep.subr.bf16.mxu1 %v1479_v15 }
  0x96   : > { %460 = vmax.xlane.f32.xlu0 %v459_v0  ;;  %1317 = vmatprep.subr.bf16.mxu0 %v1478_v14 }
  0x98   : > { %1358 = vmatpush3.bf16.msra.mxu1 %v1481_v21 }
  0x99   : > { %1318 = vmatpush3.bf16.msra.mxu0 %v1480_v20  ;;  %1359 = vmatprep.subr.bf16.mxu1 %v1483_v25 }
  0x9a   : > { %1319 = vmatprep.subr.bf16.mxu0 %v1482_v22 }
  0x9c   : > { %1360 = vmatpush3.bf16.msra.mxu1 %v1485_v27 }
  0x9d   : > { %1320 = vmatpush3.bf16.msra.mxu0 %v1484_v26  ;;  %1361 = vmatprep.subr.bf16.mxu1 %v1487_v33 }
  0x9e   : > { %1321 = vmatprep.subr.bf16.mxu0 %v1486_v32 }
  0xa0   : > { %1362 = vmatpush3.bf16.msra.mxu1 %v1489_v35 }
  0xa1   : > { %1322 = vmatpush3.bf16.msra.mxu0 %v1488_v34  ;;  %1363 = vmatprep.subr.bf16.mxu1 %v1491_v37 }
  0xa2   : > { %1323 = vmatprep.subr.bf16.mxu0 %v1490_v36 }
  0xa4   : > { %1364 = vmatpush3.bf16.msra.mxu1 %v1493_v39 }
  0xa5   : > { %1324 = vmatpush3.bf16.msra.mxu0 %v1492_v38 }
 0x104   : > { %v431_v50 = vpop.xlane.xlu0 %430 }
 0x105   : > { %v467_v53 = vsub.f32 %v1980_v28, %v431_v50  ;;  %v469_v3 = vsub.f32 %v1988_v30, %v431_v50  ;;  %v468_v12 = vsub.f32 %v1984_v29, %v431_v50 }
 0x106   : > { %v441_v51 = vpop.xlane.xlu1 %440 }
 0x107   : > { %v476_v4 = vsub.f32 %v2009_v42, %v441_v51  ;;  %v478_v62 = vsub.f32 %v2019_v45, %v441_v51  ;;  %v477_v27 = vsub.f32 %v2015_v44, %v441_v51 }
 0x10a   : > { %v436_v52 = vpop.xlane.xlu0 %435 }
 0x10b   : > { %v471_v54 = vsub.f32 %v2036_v57, %v436_v52  ;;  %v473_v1 = vsub.f32 %v2044_v59, %v436_v52  ;;  %v472_v5 = vsub.f32 %v2040_v58, %v436_v52  ;;  %v474_v63 = vsub.f32 %v2051_v61, %v436_v52 }
 0x10c   : > { %v470_v57 = vsub.f32 %v1993_v31, %v431_v50  ;;  %v475_v61 = vsub.f32 %v2005_v41, %v441_v51 }
 0x10d   : > { %v499_v6 = vpack.c.bf16 %v471_v54, %v467_v53  ;;  %v501_v0 = vpack.c.bf16 %v473_v1, %v469_v3  ;;  %v500_v42 = vpack.c.bf16 %v472_v5, %v468_v12 }
 0x10e   : > { %v446_v11 = vpop.xlane.xlu1 %445  ;;  %v502_v20 = vpack.c.bf16 %v474_v63, %v470_v57 }
 0x10f   : > { %v480_v28 = vsub.f32 %v2078_v18, %v446_v11  ;;  %v482_v59 = vsub.f32 %v2093_v23, %v446_v11  ;;  %v516_v30 = vmul.bf16 1069105081, %v499_v6  ;;  %v522_v14 = vmul.bf16 1069105081, %v501_v0 }
 0x110   : > { %v479_v21 = vsub.f32 %v2073_v16, %v446_v11  ;;  %v519_v31 = vmul.bf16 1069105081, %v500_v42  ;;  %v525_v26 = vmul.bf16 1069105081, %v502_v20  ;;  %v481_v32 = vsub.f32 %v2083_v19, %v446_v11 }
 0x111   : > { %v504_v13 = vpack.c.bf16 %v480_v28, %v476_v4  ;;  %v506_v58 = vpack.c.bf16 %v482_v59, %v478_v62  ;;  %1494 = vpow.bf16 %v516_v30  ;;  %v1723_v20 = vmov 32  }
 0x112   : > { %1496 = vpow.bf16 %v522_v14  ;;  %v503_v16 = vpack.c.bf16 %v479_v21, %v475_v61  ;;  %v505_v34 = vpack.c.bf16 %v481_v32, %v477_v27  ;;  %1460 = vset.pattern.permute.xlu0 %v1723_v20  ;;  %1461 = vset.pattern.permute.xlu1 %v1723_v20 }
 0x113   : > { %v456_v15 = vpop.xlane.xlu1 %455  ;;  %v531_v45 = vmul.bf16 1069105081, %v504_v13  ;;  %v537_v22 = vmul.bf16 1069105081, %v506_v58 }
 0x114   : > { %v488_v29 = vsub.f32 %v2108_v40, %v456_v15  ;;  %v490_v23 = vsub.f32 %v2118_v46, %v456_v15  ;;  %v487_v35 = vsub.f32 %v2102_v17, %v456_v15  ;;  %v528_v36 = vmul.bf16 1069105081, %v503_v16 }
 0x115   : > { %1498 = vpow.bf16 %v531_v45  ;;  %v489_v44 = vsub.f32 %v2113_v43, %v456_v15  ;;  %v534_v50 = vmul.bf16 1069105081, %v505_v34 }
 0x116   : > { %v451_v18 = vpop.xlane.xlu0 %450  ;;  %1500 = vpow.bf16 %v537_v22 }
 0x117   : > { %v484_v25 = vsub.f32 %v2138_v8, %v451_v18  ;;  %v486_v41 = vsub.f32 %v2142_v10, %v451_v18  ;;  %1502 = vpow.bf16 %v519_v31  ;;  %v483_v46 = vsub.f32 %v2136_v7, %v451_v18 }
 0x118   : > { %1504 = vpow.bf16 %v525_v26  ;;  %v485_v19 = vsub.f32 %v2140_v9, %v451_v18 }
 0x119   : > { %v508_v33 = vpack.c.bf16 %v488_v29, %v484_v25  ;;  %v510_v40 = vpack.c.bf16 %v490_v23, %v486_v41  ;;  %v507_v51 = vpack.c.bf16 %v487_v35, %v483_v46  ;;  %1506 = vpow.bf16 %v528_v36 }
 0x11a   : > { %v509_v53 = vpack.c.bf16 %v489_v44, %v485_v19 }
 0x11b   : > { %v466_v8 = vpop.xlane.xlu1 %465  ;;  %v543_v37 = vmul.bf16 1069105081, %v508_v33  ;;  %v549_v38 = vmul.bf16 1069105081, %v510_v40  ;;  %v540_v1 = vmul.bf16 1069105081, %v507_v51 }
 0x11c   : > { %v496_v10 = vsub.f32 %v2158_v47, %v466_v8  ;;  %v498_v39 = vsub.f32 %v2162_v49, %v466_v8  ;;  %v546_v47 = vmul.bf16 1069105081, %v509_v53  ;;  %v495_v49 = vsub.f32 %v2156_v2, %v466_v8 }
 0x11d   : > { %1508 = vpow.bf16 %v543_v37  ;;  %v497_v6 = vsub.f32 %v2160_v48, %v466_v8 }
 0x11e   : > { %1510 = vpow.bf16 %v549_v38 }
 0x11f   : > { %v461_v52 = vpop.xlane.xlu0 %460  ;;  %v1495_v9 = vpop.eup %1494  ;;  %1512 = vpow.bf16 %v534_v50 }
 0x120   : > { %v492_v17 = vsub.f32 %v2174_v56, %v461_v52  ;;  %v494_v7 = vsub.f32 %v2179_v60, %v461_v52  ;;  %v1497_v3 = vpop.eup %1496  ;;  %v491_v4 = vsub.f32 %v2172_v55, %v461_v52  ;;  %v493_v56 = vsub.f32 %v2176_v24, %v461_v52 }
 0x121   : > { %1514 = vpow.bf16 %v540_v1 }
 0x122   : > { %v512_v43 = vpack.c.bf16 %v496_v10, %v492_v17  ;;  %v514_v54 = vpack.c.bf16 %v498_v39, %v494_v7  ;;  %1516 = vpow.bf16 %v546_v47  ;;  %v511_v12 = vpack.c.bf16 %v495_v49, %v491_v4 }
 0x123   : > { %v1499_v5 = vpop.eup %1498  ;;  %v513_v28 = vpack.c.bf16 %v497_v6, %v493_v56 }
 0x124   : > { %v555_v62 = vmul.bf16 1069105081, %v512_v43  ;;  %v1501_v60 = vpop.eup %1500  ;;  %v561_v63 = vmul.bf16 1069105081, %v514_v54  ;;  %v552_v2 = vmul.bf16 1069105081, %v511_v12 }
 0x125   : > { %v1503_v0 = vpop.eup %1502  ;;  %v558_v48 = vmul.bf16 1069105081, %v513_v28 }
 0x126   : > { %v1505_v11 = vpop.eup %1504  ;;  %851 = vmatprep.mubr.bf16.mxu0 %v1503_v0  ;;  %1518 = vpow.bf16 %v555_v62 }
 0x127   : > { %916 = vmatprep.mubr.bf16.mxu1 %v1505_v11  ;;  %852 = vmatmul.mubr.bf16.vlgmr.msra.gmra.mxu0 %v1495_v9  ;;  %1520 = vpow.bf16 %v561_v63  ;;  %v1507_v55 = vpop.eup %1506 }
 0x128   : > { %917 = vmatmul.mubr.bf16.vlgmr.msra.gmra.mxu1 %v1497_v3  ;;  %859 = vmatprep.mubr.bf16.mxu0 %v1499_v5  ;;  %1522 = vpow.bf16 %v552_v2 }
 0x129   : > { %924 = vmatprep.mubr.bf16.mxu1 %v1501_v60  ;;  %1524 = vpow.bf16 %v558_v48 }
 0x12b   : > { %v1509_v24 = vpop.eup %1508 }
 0x12c   : > { %v1511_v57 = vpop.eup %1510 }
 0x12d   : > { %v1513_v59 = vpop.eup %1512 }
 0x12f   : > { %860 = vmatmul.mubr.bf16.gmra.mxu0 %v1507_v55  ;;  %v1515_v30 = vpop.eup %1514 }
 0x130   : > { %925 = vmatmul.mubr.bf16.gmra.mxu1 %v1513_v59  ;;  %867 = vmatprep.mubr.bf16.mxu0 %v1509_v24  ;;  %v1517_v13 = vpop.eup %1516 }
 0x131   : > { %932 = vmatprep.mubr.bf16.mxu1 %v1511_v57 }
 0x134   : > { %v1519_v42 = vpop.eup %1518 }
 0x135   : > { %v1521_v14 = vpop.eup %1520 }
 0x136   : > { %v1523_v58 = vpop.eup %1522 }
 0x137   : > { %868 = vmatmul.mubr.bf16.gmra.mxu0 %v1515_v30  ;;  %v1525_v15 = vpop.eup %1524 }
 0x138   : > { %933 = vmatmul.mubr.bf16.gmra.mxu1 %v1517_v13  ;;  %875 = vmatprep.mubr.bf16.mxu0 %v1519_v42 }
 0x139   : > { %940 = vmatprep.mubr.bf16.mxu1 %v1521_v14 }
 0x13f   : > { %876 = vmatmul.mubr.bf16.gmra.mxu0 %v1523_v58 }
 0x140   : > { %941 = vmatmul.mubr.bf16.gmra.mxu1 %v1525_v15 }
 0x1e7   : > { %v1325_v45 = vpop.f32.mrf.mxu0 }
 0x1e8   : > { %v1365_v61 = vpop.f32.mrf.mxu1 }
 0x1e9   : > { %v1326_v21 = vpop.f32.mrf.mxu0 }
 0x1ea   : > { %v1327_v22 = vadd.f32 %v1326_v21, %v1325_v45  ;;  %v1366_v29 = vpop.f32.mrf.mxu1  ;;  %v1013_v45 = vld [vmem:[%s1923_s13] sm:$0xff] }
 0x1eb   : > { %v1367_v18 = vadd.f32 %v1366_v29, %v1365_v61  ;;  %v1328_v31 = vpop.f32.mrf.mxu0  ;;  %v1260_v61 = vld [vmem:[%s2312_s3] ss:$0 sm:$0xff]  ;;  %v1014_v29 = vld [vmem:[%s1923_s13 + $0x8] sm:$0xff] }
 0x1ec   : > { %v1368_v23 = vpop.f32.mrf.mxu1  ;;  %v1028_v21 = vadd.f32 %v1260_v61, %v1013_v45 }
 0x1ed   : > { %v2217_v25 = vadd.f32 %v1367_v18, %v1327_v22  ;;  %v1329_v26 = vpop.f32.mrf.mxu0 }
 0x1ee   : > { %v1330_v27 = vadd.f32 %v1329_v26, %v1328_v31  ;;  %v1369_v32 = vpop.f32.mrf.mxu1  ;;  %v1029_v31 = vadd.f32 %v1260_v61, %v1014_v29 }
 0x1ef   : > { %1526 = vrcp.f32 %v2217_v25  ;;  %v1370_v41 = vadd.f32 %v1369_v32, %v1368_v23  ;;  %v1331_v16 = vpop.f32.mrf.mxu0  ;;  %v1015_v32 = vld [vmem:[%s1923_s13 + $0x10] sm:$0xff] }
 0x1f0   : > { %v1371_v33 = vpop.f32.mrf.mxu1 }
 0x1f1   : > { %v2220_v40 = vadd.f32 %v1370_v41, %v1330_v27  ;;  %v1332_v34 = vpop.f32.mrf.mxu0 }
 0x1f2   : > { %v1333_v35 = vadd.f32 %v1332_v34, %v1331_v16  ;;  %v1372_v46 = vpop.f32.mrf.mxu1  ;;  %v1030_v16 = vadd.f32 %v1260_v61, %v1015_v32  ;;  %v1016_v34 = vld [vmem:[%s1923_s13 + $0x18] sm:$0xff] }
 0x1f3   : > { %1528 = vrcp.f32 %v2220_v40  ;;  %v1373_v8 = vadd.f32 %v1372_v46, %v1371_v33  ;;  %v1334_v36 = vpop.f32.mrf.mxu0  ;;  %v1031_v46 = vadd.f32 %v1260_v61, %v1016_v34 }
 0x1f4   : > { %v1374_v44 = vpop.f32.mrf.mxu1 }
 0x1f5   : > { %v2223_v19 = vadd.f32 %v1373_v8, %v1333_v35  ;;  %v1335_v37 = vpop.f32.mrf.mxu0 }
 0x1f6   : > { %v1336_v38 = vadd.f32 %v1335_v37, %v1334_v36  ;;  %v1375_v10 = vpop.f32.mrf.mxu1 }
 0x1f7   : > { %1530 = vrcp.f32 %v2223_v19  ;;  %v1376_v39 = vadd.f32 %v1375_v10, %v1374_v44  ;;  %v1337_v50 = vpop.f32.mrf.mxu0  ;;  %v1017_v44 = vld [vmem:[%s1923_s13 + $0x20] sm:$0xff]  ;;  %v1018_v10 = vld [vmem:[%s1923_s13 + $0x28] sm:$0xff] }
 0x1f8   : > { %v1377_v51 = vpop.f32.mrf.mxu1 }
 0x1f9   : > { %v2226_v52 = vadd.f32 %v1376_v39, %v1336_v38  ;;  %v1338_v53 = vpop.f32.mrf.mxu0 }
 0x1fa   : > { %v1339_v17 = vadd.f32 %v1338_v53, %v1337_v50  ;;  %v1378_v7 = vpop.f32.mrf.mxu1  ;;  %v1033_v50 = vadd.f32 %v1260_v61, %v1018_v10 }
 0x1fb   : > { %1532 = vrcp.f32 %v2226_v52  ;;  %v1379_v43 = vadd.f32 %v1378_v7, %v1377_v51  ;;  %v1340_v54 = vpop.f32.mrf.mxu0  ;;  %v1019_v7 = vld [vmem:[%s1923_s13 + $0x30] sm:$0xff] }
 0x1fc   : > { %v1527_v9 = vpop.eup %1526  ;;  %v1380_v1 = vpop.f32.mrf.mxu1 }
 0x1fd   : > { %v2229_v3 = vadd.f32 %v1379_v43, %v1339_v17  ;;  %967 = vperm.xlu0 %1460, %v1527_v9   ;;  %v1341_v47 = vpop.f32.mrf.mxu0  ;;  %v1034_v9 = vadd.f32 %v1260_v61, %v1019_v7 }
 0x1fe   : > { %v1342_v49 = vadd.f32 %v1341_v47, %v1340_v54  ;;  %v1381_v4 = vpop.f32.mrf.mxu1  ;;  %v1020_v47 = vld [vmem:[%s1923_s13 + $0x38] sm:$0xff] }
 0x1ff   : > { %1534 = vrcp.f32 %v2229_v3  ;;  %v1382_v5 = vadd.f32 %v1381_v4, %v1380_v1  ;;  %v1343_v6 = vpop.f32.mrf.mxu0 }
 0x200   : > { %v1529_v56 = vpop.eup %1528  ;;  %v1383_v62 = vpop.f32.mrf.mxu1 }
 0x201   : > { %v2232_v60 = vadd.f32 %v1382_v5, %v1342_v49  ;;  %972 = vperm.xlu1 %1461, %v1529_v56   ;;  %v1344_v63 = vpop.f32.mrf.mxu0  ;;  %v1035_v49 = vadd.f32 %v1260_v61, %v1020_v47 }
 0x202   : > { %v1345_v0 = vadd.f32 %v1344_v63, %v1343_v6  ;;  %v1384_v11 = vpop.f32.mrf.mxu1 }
 0x203   : > { %1536 = vrcp.f32 %v2232_v60  ;;  %v1385_v12 = vadd.f32 %v1384_v11, %v1383_v62  ;;  %v1346_v28 = vpop.f32.mrf.mxu0 }
 0x204   : > { %v1531_v2 = vpop.eup %1530  ;;  %v1386_v48 = vpop.f32.mrf.mxu1 }
 0x205   : > { %v2235_v55 = vadd.f32 %v1385_v12, %v1345_v0  ;;  %977 = vperm.xlu1 %1461, %v1531_v2   ;;  %v1347_v24 = vpop.f32.mrf.mxu0 }
 0x206   : > { %v1348_v57 = vadd.f32 %v1347_v24, %v1346_v28  ;;  %v1387_v59 = vpop.f32.mrf.mxu1 }
 0x207   : > { %1538 = vrcp.f32 %v2235_v55  ;;  %v1388_v30 = vadd.f32 %v1387_v59, %v1386_v48 }
 0x208   : > { %v1533_v13 = vpop.eup %1532 }
 0x209   : > { %v2238_v42 = vadd.f32 %v1388_v30, %v1348_v57  ;;  %982 = vperm.xlu1 %1461, %v1533_v13  }
 0x20b   : > { %1540 = vrcp.f32 %v2238_v42 }
 0x20c   : > { %v1535_v14 = vpop.eup %1534 }
 0x20d   : > { %987 = vperm.xlu1 %1461, %v1535_v14  }
 0x210   : > { %v1537_v58 = vpop.eup %1536 }
 0x211   : > { %992 = vperm.xlu1 %1461, %v1537_v58  }
 0x214   : > { %v1539_v15 = vpop.eup %1538 }
 0x215   : > { %997 = vperm.xlu1 %1461, %v1539_v15  }
 0x218   : > { %v1541_v20 = vpop.eup %1540 }
 0x219   : > { %1002 = vperm.xlu1 %1461, %v1541_v20  }
 0x278   : > { %v968_v22 = vpop.permute.xlu0 %967 }
 0x279   : > { %v1005_v18 = vmul.f32 %v968_v22, %v2217_v25 }
 0x27b   : > { %v1036_v23 = vsub.f32 %v1028_v21, %v1005_v18 }
 0x27c   : > { %v973_v26 = vpop.permute.xlu1 %972 }
 0x27d   : > { %v1006_v27 = vmul.f32 %v973_v26, %v2220_v40  ;;  %1542 = vtanh.f32 %v1036_v23  ;;  %v1032_v40 = vadd.f32 %v1260_v61, %v1017_v44 }
 0x27f   : > { %v1037_v41 = vsub.f32 %v1029_v31, %v1006_v27 }
 0x280   : > { %v978_v33 = vpop.permute.xlu1 %977 }
 0x281   : > { %1544 = vtanh.f32 %v1037_v41  ;;  %v1007_v35 = vmul.f32 %v978_v33, %v2223_v19 }
 0x283   : > { %v1038_v8 = vsub.f32 %v1030_v16, %v1007_v35 }
 0x284   : > { %v983_v25 = vpop.permute.xlu1 %982 }
 0x285   : > { %v1008_v36 = vmul.f32 %v983_v25, %v2226_v52  ;;  %1546 = vtanh.f32 %v1038_v8 }
 0x287   : > { %v1039_v37 = vsub.f32 %v1031_v46, %v1008_v36 }
 0x288   : > { %v988_v38 = vpop.permute.xlu1 %987 }
 0x289   : > { %1548 = vtanh.f32 %v1039_v37  ;;  %v1009_v39 = vmul.f32 %v988_v38, %v2229_v3 }
 0x28a   : > { %v1543_v53 = vpop.eup %1542 }
 0x28b   : > { %v1040_v51 = vsub.f32 %v1032_v40, %v1009_v39 }
 0x28c   : > { %v993_v19 = vpop.permute.xlu1 %992 }
 0x28d   : > { %v1010_v17 = vmul.f32 %v993_v19, %v2232_v60  ;;  %1550 = vtanh.f32 %v1040_v51 }
 0x28e   : > { %v1545_v43 = vpop.eup %1544 }
 0x28f   : > { %v1289_v52 = vpack.c.bf16 %v1545_v43, %v1543_v53  ;;  %v1041_v54 = vsub.f32 %v1033_v50, %v1010_v17 }
 0x290   : > { %v998_v1 = vpop.permute.xlu1 %997 }
 0x291   : > { %1290 = vst [vmem:[%s270_s30] sm:$0xff] %v1289_v52   ;;  %1552 = vtanh.f32 %v1041_v54  ;;  %v1011_v3 = vmul.f32 %v998_v1, %v2235_v55 }
 0x292   : > { %v1547_v6 = vpop.eup %1546 }
 0x293   : > { %v1042_v4 = vsub.f32 %v1034_v9, %v1011_v3 }
 0x294   : > { %v1003_v5 = vpop.permute.xlu1 %1002 }
 0x295   : > { %v1012_v56 = vmul.f32 %v1003_v5, %v2238_v42  ;;  %1554 = vtanh.f32 %v1042_v4 }
 0x296   : > { %v1549_v62 = vpop.eup %1548 }
 0x297   : > { %v1294_v60 = vpack.c.bf16 %v1549_v62, %v1547_v6  ;;  %v1043_v63 = vsub.f32 %v1035_v49, %v1012_v56 }
 0x299   : > { %1306 = vst [vmem:[%s270_s30 + $0x8] sm:$0xff] %v1294_v60   ;;  %1556 = vtanh.f32 %v1043_v63 }
 0x29a   : > { %v1551_v0 = vpop.eup %1550 }
 0x29e   : > { %v1553_v11 = vpop.eup %1552 }
 0x29f   : > { %v1299_v12 = vpack.c.bf16 %v1553_v11, %v1551_v0 }
 0x2a1   : > { %1307 = vst [vmem:[%s270_s30 + $0x10] sm:$0xff] %v1299_v12  }
 0x2a2   : > { %v1555_v28 = vpop.eup %1554 }
 0x2a6   : > { %v1557_v2 = vpop.eup %1556 }
 0x2a7   : > { %v1304_v48 = vpack.c.bf16 %v1557_v2, %v1555_v28 }
 0x2a9   : > { %1308 = vst [vmem:[%s270_s30 + $0x18] sm:$0xff] %v1304_v48  }
 0x2aa   : > { %1653 = shalt.err (!%p1650_p12)
}
 0x2ab   : > { %s1654_s0 = scalar_lea.hbm %s2265_s2, 512  ;;  %s1658_s13 = scalar_lea.hbm %s2313_s4, 4096 }
 0x2ac   : > { %p1655_p1 = scmp.ne.s32.totalorder %s2265_s2, %s1654_s0  ;;  %p1659_p7 = scmp.lt.s32.totalorder %s2265_s2, %s2313_s4 }
 0x2ad   : > { %p1660_p8 = scmp.lt.s32.totalorder %s1658_s13, %s1654_s0 }
 0x2ae   : > { %p1656_p4 = pnand %p1655_p1, %p2331_p11 }
 0x2af   : > { %p1661_p10 = por %p1660_p8, %p1659_p7 }
 0x2b0   : > { %p1657_p3 = pneg %p1656_p4 }
 0x2b2   : > { %p1662_p6 = pnand %p1661_p10, %p1657_p3 }
 0x2b4   : > { %1665 = shalt.err (!%p1662_p6)
}
 0x2b5   : > { %s1725_s26 = smov 64   ;;  %s1726_s29 = smov 4  }
 0x2b6   : > { %1397 = dma.vmem_to_hbm [thread:$0]  (%p2331_p11), %s2267_s6, 512, %s2265_s2, %s1093_s12, %s1725_s26, %s1725_s26, %s1726_s29  }
 0x2b7 PF: > { %p1417_p2 = scmp.ge.s32.totalorder %s1712_s18, 2  ;;  %s1121_s30 = sand.u32 1, %s1700_s15  }
 0x2b8   : > { %p2332_p13 = scmp.ne.s32.totalorder %s2320_s22, 0  ;;  %s1122_s5 = scalar_lea.sflag [#allocation4], %s1121_s30 }
 0x2ba   : > { %p1411_p0 = pnand %p1417_p2, %p2332_p13 }
 0x2bc   : > { %p1412_p5 = pneg %p1411_p0 }
 0x2be   : > { %1695 = dma.done.wait (%p1412_p5), %s1122_s5, 512  }
 0x2bf   : > { %1697 = vsyncadd (%p1412_p5), %s1122_s5, 4294966784  ;;  %p20_p9 = scmp.ge.s32.totalorder %s1805_s27, 10   ;;  %s2333_s15 = smov %s1704_s16 }
 0x2c0   : > { %s2334_s16 = smov %s1708_s17  ;;  %s2335_s17 = smov %s1822_s9 }
 0x2c1   : > { %s2336_s18 = smov %s1805_s27  ;;  %22 = sbr.rel (!%p20_p9) target bundleno = 10 (0xa), region = 98 }
 0x2c6   :  { %1127 = vsyncpa [#allocation3], 1 }
 0x2c7   :  { %1129 = vsyncpa [#allocation3 + $0x1], 1 }
 0x2c8   :  { %1130 = vsyncpa [#allocation6], 1 }
 0x2c9   :  { %1132 = vsyncpa [#allocation6 + $0x1], 1 }
 0x2ca   :  { %1133 = vsyncpa [#allocation4], 1 }
 0x2cb   :  { %1135 = vsyncpa [#allocation4 + $0x1], 1 }

</bundles_post_ra>
